<compile_context>
chip_gen: v6e
topology: v6e:2x2x1
jax: 0.10.0
libtpu: 0.0.40
codegen_flags: <defaults>
</compile_context>

<pallas_src>
import numpy as np
import jax
import jax.numpy as jnp
from jax.experimental import pallas as pl
from jax.experimental.pallas import tpu as pltpu

# ---- problem sizes (small, consistent with the module) ----------------------
B = 2                            # batch
C_IN, H_IN, W_IN = 4, 16, 16
D_IN = C_IN * H_IN * W_IN        # 1024, flattened feature dim
HIDDEN = 32                      # encoder_fc output dim
HIDDEN_PAD = 128                 # lane-padded hidden (extra lanes are exact zeros)
NUM_CLASSES = 4                  # classifier output dim / number of discriminators
NUM_GROUPS = 2                   # discriminator output dim (protected attribute)
OUT_LANES = 128                  # lane-dense padded output width
G0_OFF = NUM_CLASSES                      # lanes [4, 8):  disc group-0 logits
G1_OFF = NUM_CLASSES + OUT_LANES // 2     # lanes [68, 72): disc group-1 logits


def cfair_kernel(x_ref, w1_ref, wh_ref, b_ref, out_ref):
    b1 = b_ref[0:1, :]            # (1, 128) encoder_fc bias (HIDDEN lanes, rest 0)
    bh = b_ref[1:2, :]            # (1, 128) fused classifier + discriminator bias

    # encoder (Identity) already applied; encoder_fc: Linear + ReLU.
    # bf16 MXU inputs, f32 accumulate, f32 VPU math.
    h = jnp.dot(x_ref[...], w1_ref[...],
                preferred_element_type=jnp.float32) + b1
    h = jnp.maximum(h, 0.0)                                   # (B, 128) f32

    # Fused heads matmul: lanes [0,4) classifier, [4,8) disc group-0,
    # [68,72) disc group-1, everything else exact zero padding.
    z = jnp.dot(h.astype(jnp.bfloat16), wh_ref[...],
                preferred_element_type=jnp.float32) + bh      # (B, 128) f32

    lane = jax.lax.broadcasted_iota(jnp.int32, z.shape, 1)
    is_cls = lane < NUM_CLASSES
    is_g0 = (lane >= G0_OFF) & (lane < G0_OFF + NUM_CLASSES)
    is_g1 = (lane >= G1_OFF) & (lane < G1_OFF + NUM_CLASSES)

    # classifier log_softmax (dim=1) over lanes [0, NUM_CLASSES), numerically
    # stable, full-row XLU reduce with an iota lane mask (no sub-lane slices).
    z_cls = jnp.where(is_cls, z, jnp.float32(-1e30))
    m_cls = jnp.max(z_cls, axis=-1, keepdims=True)
    lse_cls = m_cls + jnp.log(jnp.sum(jnp.exp(z_cls - m_cls),
                                      axis=-1, keepdims=True))          # (B, 1)

    # grad_reverse is the identity in the forward pass.
    # Discriminator 2-way log_softmax: group-1 columns sit exactly
    # OUT_LANES//2 lanes after group-0, so one self-inverse half-rotation
    # (+64 == -64 mod 128) pairs every lane with its partner; the same
    # element-wise lse chain is valid at both group-0 and group-1 lanes.
    partner = pltpu.roll(z, OUT_LANES // 2, axis=1)
    md = jnp.maximum(z, partner)
    lse_pair = md + jnp.log(jnp.exp(z - md) + jnp.exp(partner - md))    # (B, 128)

    res = z - jnp.where(is_cls, lse_cls, lse_pair)
    # One unmasked lane-dense (B, 128) store; zero the padding lanes so the
    # output layout is deterministic.
    out_ref[...] = jnp.where(is_cls | is_g0 | is_g1, res, 0.0)


def make_params(key):
    """Raw (un-fused) parameters, torch-Linear-like init."""
    k1, k2, k3, k4, k5, k6 = jax.random.split(key, 6)
    scale1 = 1.0 / np.sqrt(D_IN)
    scale2 = 1.0 / np.sqrt(HIDDEN)
    return dict(
        w1=jax.random.uniform(k1, (D_IN, HIDDEN), jnp.float32, -scale1, scale1),
        b1=jax.random.uniform(k2, (1, HIDDEN), jnp.float32, -scale1, scale1),
        w2=jax.random.uniform(k3, (HIDDEN, NUM_CLASSES), jnp.float32, -scale2, scale2),
        b2=jax.random.uniform(k4, (1, NUM_CLASSES), jnp.float32, -scale2, scale2),
        wd=jax.random.uniform(k5, (NUM_CLASSES, HIDDEN, NUM_GROUPS), jnp.float32,
                              -scale2, scale2),
        bd=jax.random.uniform(k6, (NUM_CLASSES, 1, NUM_GROUPS), jnp.float32,
                              -scale2, scale2),
    )


def fuse_params(params):
    """Build the fused, lane-padded, bf16 kernel parameters (4 inputs total)."""
    nc, ng = NUM_CLASSES, NUM_GROUPS
    assert ng == 2, "half-roll pairing in the kernel assumes a binary protected attribute"

    # encoder_fc weight, HIDDEN padded to 128 (extra columns are exact zeros).
    w1 = jnp.zeros((D_IN, HIDDEN_PAD), jnp.float32)
    w1 = w1.at[:, :HIDDEN].set(params["w1"])

    # fused heads weight slab: classifier at lanes [0,nc), disc head c group g
    # at lane (G0_OFF or G1_OFF) + c.  Extra rows/columns are exact zeros.
    wh = jnp.zeros((HIDDEN_PAD, OUT_LANES), jnp.float32)
    wh = wh.at[:HIDDEN, :nc].set(params["w2"])
    wd_t = jnp.transpose(params["wd"], (1, 0, 2))          # (HIDDEN, nc, ng)
    wh = wh.at[:HIDDEN, G0_OFF:G0_OFF + nc].set(wd_t[:, :, 0])
    wh = wh.at[:HIDDEN, G1_OFF:G1_OFF + nc].set(wd_t[:, :, 1])

    # both biases packed into one pre-padded (8, 128) f32 slab (rows 0 and 1).
    bias = jnp.zeros((8, OUT_LANES), jnp.float32)
    bias = bias.at[0, :HIDDEN].set(params["b1"][0])
    bias = bias.at[1, :nc].set(params["b2"][0])
    bias = bias.at[1, G0_OFF:G0_OFF + nc].set(params["bd"][:, 0, 0])
    bias = bias.at[1, G1_OFF:G1_OFF + nc].set(params["bd"][:, 0, 1])

    return dict(w1=w1.astype(jnp.bfloat16), wh=wh.astype(jnp.bfloat16), bias=bias)


@jax.jit
def _forward_core(x_nchw, labels, w1, wh, bias):
    """Flatten/cast + kernel call + fixed-shape output assembly, fully jitted."""
    x_flat = x_nchw.reshape(x_nchw.shape[0], -1).astype(jnp.bfloat16)

    vmem = pltpu.MemorySpace.VMEM
    out = pl.pallas_call(
        cfair_kernel,
        out_shape=jax.ShapeDtypeStruct((B, OUT_LANES), jnp.float32),
        in_specs=[pl.BlockSpec(memory_space=vmem)] * 4,
        out_specs=pl.BlockSpec(memory_space=vmem),
    )(x_flat, w1, wh, bias)

    logprobs = out[:, :NUM_CLASSES]
    # disc[b, j, g] = log-prob of group g under discriminator head j for row b
    disc = jnp.stack([out[:, G0_OFF:G0_OFF + NUM_CLASSES],
                      out[:, G1_OFF:G1_OFF + NUM_CLASSES]], axis=-1)  # (B, NC, NG)
    mask = labels[:, None] == jnp.arange(NUM_CLASSES, dtype=labels.dtype)[None, :]
    disc_masked = jnp.where(mask[:, :, None], disc, 0.0)
    return logprobs, disc_masked, mask


def cfair_forward(x_nchw, labels, kparams):
    """CFairNet.forward with fixed-shape outputs (no device->host syncs).

    Returns (logprobs, disc_masked, mask):
      logprobs    (B, NUM_CLASSES)             classifier log-probs
      disc_masked (B, NUM_CLASSES, NUM_GROUPS) discriminator log-probs; row b of
                                               head j is zeroed unless labels[b]==j
      mask        (B, NUM_CLASSES) bool        labels[b] == j
    """
    return _forward_core(x_nchw, labels, kparams["w1"], kparams["wh"], kparams["bias"])


def c_losses_ragged(disc_masked, labels):
    # TODO(synk): torch returns variable-length per-class tensors; this boolean
    # __getitem__ forces a device->host size sync per class, so it is kept out
    # of the fixed-shape hot path and used only for reference parity checks.
    return [disc_masked[:, j, :][labels == j] for j in range(NUM_CLASSES)]


def cfair_forward_ref(x_nchw, labels, params):
    """Pure-JAX reference (same bf16-in / f32-accumulate matmul convention)."""
    x = x_nchw.reshape(x_nchw.shape[0], -1).astype(jnp.bfloat16)
    h = jnp.dot(x, params["w1"].astype(jnp.bfloat16),
                preferred_element_type=jnp.float32) + params["b1"]
    h = jnp.maximum(h, 0.0)
    hb = h.astype(jnp.bfloat16)

    pre = jnp.dot(hb, params["w2"].astype(jnp.bfloat16),
                  preferred_element_type=jnp.float32) + params["b2"]
    logprobs = jax.nn.log_softmax(pre, axis=1)

    c_losses = []
    for j in range(NUM_CLASSES):
        d = jnp.dot(hb, params["wd"][j].astype(jnp.bfloat16),
                    preferred_element_type=jnp.float32) + params["bd"][j]
        d = jax.nn.log_softmax(d, axis=1)
        c_losses.append(d[labels == j])
    return logprobs, c_losses


if __name__ == "__main__":
    key = jax.random.PRNGKey(0)
    kx, kl, kp = jax.random.split(key, 3)

    x = jax.random.normal(kx, (B, C_IN, H_IN, W_IN), jnp.float32)
    labels = jax.random.randint(kl, (B,), 0, NUM_CLASSES)
    params = make_params(kp)
    kparams = fuse_params(params)

    logprobs, disc_masked, mask = cfair_forward(x, labels, kparams)
    jax.block_until_ready((logprobs, disc_masked, mask))

    # verify against pure-JAX reference (ragged selection only done here, for parity)
    logprobs_ref, c_losses_ref = cfair_forward_ref(x, labels, params)
    np.testing.assert_allclose(np.asarray(logprobs), np.asarray(logprobs_ref),
                               rtol=2e-3, atol=2e-3)
    c_losses = c_losses_ragged(disc_masked, labels)
    for a, b_ref in zip(c_losses, c_losses_ref):
        assert a.shape == b_ref.shape
        np.testing.assert_allclose(np.asarray(a), np.asarray(b_ref),
                                   rtol=2e-3, atol=2e-3)

    print("KERNEL_OK")
</pallas_src>

<mosaic_0001>
module attributes {stable_mosaic.version = 11 : i64} {
  func.func @cfair_kernel(%arg0: memref<2x1024xbf16, #tpu.memory_space<vmem>>, %arg1: memref<1024x128xbf16, #tpu.memory_space<vmem>>, %arg2: memref<128x128xbf16, #tpu.memory_space<vmem>>, %arg3: memref<8x128xf32, #tpu.memory_space<vmem>>, %arg4: memref<2x128xf32, #tpu.memory_space<vmem>>) attributes {dimension_semantics = [], scalar_prefetch = 0 : i64, scratch_operands = 0 : i64, tpu.core_type = #tpu.core_type<tc>} {
    %c0 = arith.constant 0 : index
    %c0_0 = arith.constant 0 : index
    %0 = vector.load %arg3[%c0, %c0_0] : memref<8x128xf32, #tpu.memory_space<vmem>>, vector<1x128xf32>
    %c1 = arith.constant 1 : index
    %c0_1 = arith.constant 0 : index
    %1 = vector.load %arg3[%c1, %c0_1] : memref<8x128xf32, #tpu.memory_space<vmem>>, vector<1x128xf32>
    %c0_2 = arith.constant 0 : index
    %c0_3 = arith.constant 0 : index
    %2 = vector.load %arg0[%c0_2, %c0_3] : memref<2x1024xbf16, #tpu.memory_space<vmem>>, vector<2x1024xbf16>
    %c0_4 = arith.constant 0 : index
    %c0_5 = arith.constant 0 : index
    %3 = vector.load %arg1[%c0_4, %c0_5] : memref<1024x128xbf16, #tpu.memory_space<vmem>>, vector<1024x128xbf16>
    %cst = arith.constant dense<0.000000e+00> : vector<2x128xf32>
    %4 = tpu.matmul %2, %3, %cst {dimension_numbers = #tpu.dot_dimension_numbers<[1], [0], [0], [1], [0, 0, 1, 1], [], []>} : vector<2x1024xbf16>, vector<1024x128xbf16>, vector<2x128xf32> -> vector<2x128xf32>
    %5 = vector.broadcast %0 : vector<1x128xf32> to vector<2x128xf32>
    %6 = arith.addf %4, %5 : vector<2x128xf32>
    %cst_6 = arith.constant 0.000000e+00 : f32
    %7 = vector.broadcast %cst_6 : f32 to vector<2x128xf32>
    %8 = arith.maximumf %6, %7 : vector<2x128xf32>
    %9 = arith.truncf %8 : vector<2x128xf32> to vector<2x128xbf16>
    %c0_7 = arith.constant 0 : index
    %c0_8 = arith.constant 0 : index
    %10 = vector.load %arg2[%c0_7, %c0_8] : memref<128x128xbf16, #tpu.memory_space<vmem>>, vector<128x128xbf16>
    %cst_9 = arith.constant dense<0.000000e+00> : vector<2x128xf32>
    %11 = tpu.matmul %9, %10, %cst_9 {dimension_numbers = #tpu.dot_dimension_numbers<[1], [0], [0], [1], [0, 0, 1, 1], [], []>} : vector<2x128xbf16>, vector<128x128xbf16>, vector<2x128xf32> -> vector<2x128xf32>
    %12 = vector.broadcast %1 : vector<1x128xf32> to vector<2x128xf32>
    %13 = arith.addf %11, %12 : vector<2x128xf32>
    %14 = tpu.iota {dimensions = array<i32: 1>} : vector<2x128xi32>
    %c4_i32 = arith.constant 4 : i32
    %15 = vector.broadcast %c4_i32 : i32 to vector<2x128xi32>
    %16 = arith.cmpi slt, %14, %15 : vector<2x128xi32>
    %c4_i32_10 = arith.constant 4 : i32
    %17 = vector.broadcast %c4_i32_10 : i32 to vector<2x128xi32>
    %18 = arith.cmpi sge, %14, %17 : vector<2x128xi32>
    %c8_i32 = arith.constant 8 : i32
    %19 = vector.broadcast %c8_i32 : i32 to vector<2x128xi32>
    %20 = arith.cmpi slt, %14, %19 : vector<2x128xi32>
    %21 = arith.andi %18, %20 : vector<2x128xi1>
    %c68_i32 = arith.constant 68 : i32
    %22 = vector.broadcast %c68_i32 : i32 to vector<2x128xi32>
    %23 = arith.cmpi sge, %14, %22 : vector<2x128xi32>
    %c72_i32 = arith.constant 72 : i32
    %24 = vector.broadcast %c72_i32 : i32 to vector<2x128xi32>
    %25 = arith.cmpi slt, %14, %24 : vector<2x128xi32>
    %26 = arith.andi %23, %25 : vector<2x128xi1>
    %cst_11 = arith.constant -1.000000e+30 : f32
    %27 = vector.broadcast %cst_11 : f32 to vector<2x128xf32>
    %28 = arith.select %16, %13, %27 : vector<2x128xi1>, vector<2x128xf32>
    %cst_12 = arith.constant dense<0xFF800000> : vector<2xf32>
    %29 = vector.multi_reduction <maximumf>, %28, %cst_12 [1] : vector<2x128xf32> to vector<2xf32>
    %30 = vector.shape_cast %29 : vector<2xf32> to vector<2x1xf32>
    %31 = vector.broadcast %30 : vector<2x1xf32> to vector<2x128xf32>
    %32 = arith.subf %28, %31 : vector<2x128xf32>
    %33 = math.exp %32 : vector<2x128xf32>
    %cst_13 = arith.constant dense<0.000000e+00> : vector<2xf32>
    %34 = vector.multi_reduction <add>, %33, %cst_13 [1] : vector<2x128xf32> to vector<2xf32>
    %35 = vector.shape_cast %34 : vector<2xf32> to vector<2x1xf32>
    %36 = math.log %35 : vector<2x1xf32>
    %37 = arith.addf %30, %36 : vector<2x1xf32>
    %c64_i32 = arith.constant 64 : i32
    %38 = tpu.dynamic_rotate %13 by %c64_i32 dim 1 : vector<2x128xf32>, i32 -> vector<2x128xf32>
    %39 = arith.maximumf %13, %38 : vector<2x128xf32>
    %40 = arith.subf %13, %39 : vector<2x128xf32>
    %41 = math.exp %40 : vector<2x128xf32>
    %42 = arith.subf %38, %39 : vector<2x128xf32>
    %43 = math.exp %42 : vector<2x128xf32>
    %44 = arith.addf %41, %43 : vector<2x128xf32>
    %45 = math.log %44 : vector<2x128xf32>
    %46 = arith.addf %39, %45 : vector<2x128xf32>
    %47 = vector.shape_cast %37 : vector<2x1xf32> to vector<2x1xf32>
    %48 = vector.broadcast %47 : vector<2x1xf32> to vector<2x128xf32>
    %49 = arith.select %16, %48, %46 : vector<2x128xi1>, vector<2x128xf32>
    %50 = arith.subf %13, %49 : vector<2x128xf32>
    %51 = arith.ori %16, %21 : vector<2x128xi1>
    %52 = arith.ori %51, %26 : vector<2x128xi1>
    %cst_14 = arith.constant 0.000000e+00 : f32
    %53 = vector.broadcast %cst_14 : f32 to vector<2x128xf32>
    %54 = arith.select %52, %50, %53 : vector<2x128xi1>, vector<2x128xf32>
    %c0_15 = arith.constant 0 : index
    %c0_16 = arith.constant 0 : index
    %55 = vector.load %arg4[%c0_15, %c0_16] : memref<2x128xf32, #tpu.memory_space<vmem>>, vector<2x128xf32>
    tpu.vector_store %arg4[%c0_15, %c0_16], %54 {strides = array<i32>} : memref<2x128xf32, #tpu.memory_space<vmem>>, vector<2x128xf32>,
    return
  }
}

</mosaic_0001>

<bundles_post_ra>
// kernel: _forward_core.1
= control target key start
LH: loop header
LB: loop body
LE: loop exit
PB: predicated region body
PF: predicated region fallthrough
CT: control target
= control target key end

     0   :  { %9 = vsyncpa [#allocation3], 0  ;;  %s1228_s15 = smov [#allocation2]   ;;  %s1319_s0 = inlined_call_operand.vmem [shape: bf16[2,1024], index: 0, kind: input, shape index: {}]   ;;  %s1320_s1 = inlined_call_operand.hbm [shape: bf16[1024,128], index: 1, kind: input, shape index: {}]   ;;  %s1321_s2 = inlined_call_operand.vmem [shape: bf16[128,128], index: 2, kind: input, shape index: {}]   ;;  %s1322_s3 = inlined_call_operand.vmem [shape: f32[8,128], index: 3, kind: input, shape index: {}]   ;;  %s1323_s4 = inlined_call_operand.vmem [shape: f32[2,128], index: 4, kind: output, shape index: {}]  }
   0x1   :  { %s17_s16 = sshll.u32 %s1228_s15, 4  ;;  %s18_s16 = int_to_ptr.vmem [resolvable:$true] %s17_s16 }
   0x2   :  { %s1214_s17 = scalar_lea.vmem %s18_s16, 8192  ;;  %p1219_p1 = scmp.lt.s32.totalorder %s18_s16, %s18_s16 }
   0x3   :  { %p1215_p0 = scmp.ne.s32.totalorder %s18_s16, %s1214_s17  ;;  %p1220_p2 = scmp.lt.s32.totalorder %s1214_s17, %s1214_s17 }
   0x5   :  { %p1221_p3 = por %p1220_p2, %p1219_p1 }
   0x7   :  { %p1222_p4 = pnand %p1221_p3, %p1215_p0 }
   0x9   :  { %1225 = shalt.err (!%p1222_p4)
}
   0xa   :  { %s1229_s18 = smov 64   ;;  %s1230_s19 = smov 4  }
   0xb   :  { %23 = dma.hbm_to_vmem [thread:$0]  %s1320_s1, 8192, %s18_s16, [#allocation3], %s1229_s18, %s1229_s18, %s1230_s19  }
   0xc   :  { %1226 = dma.done.wait [#allocation3], 8192  }
   0xd   :  { %1227 = vsyncadd [#allocation3], 4294959104  ;;  %v1123_v0 = vld [vmem:[#allocation2 + $0x78] sm:$0xff]   ;;  %v1127_v4 = vld [vmem:[#allocation2 + $0x70] sm:$0xff]   ;;  %v1231_v22 = vmov 1966171168   ;;  %v172_v24 = vlaneseq }
   0xe   :  { %v1124_v1 = vld [vmem:[#allocation2 + $0xf8] sm:$0xff]   ;;  %1000 = vmatprep.subr.bf16.mxu0 %v1123_v0  ;;  %v1128_v5 = vld [vmem:[#allocation2 + $0xf0] sm:$0xff]   ;;  %v1131_v8 = vld [vmem:[#allocation2 + $0x68] sm:$0xff]   ;;  %v170_v23 = vunpack.c.l.s4 %v1231_v22  ;;  %vm1233_vm0 = vmmov 0   ;;  %vm889_vm2 = vcmask 1041408  }
   0xf   :  { %v1125_v2 = vld [vmem:[#allocation2 + $0x38] sm:$0xff]   ;;  %1022 = vmatprep.subr.bf16.mxu1 %v1124_v1  ;;  %v1129_v6 = vld [vmem:[#allocation2 + $0x30] sm:$0xff]   ;;  %v1132_v9 = vld [vmem:[#allocation2 + $0xe8] sm:$0xff]   ;;  %v173_v30 = vshrl.u32 %v172_v24, 7 }
  0x10   :  { %v1126_v3 = vld [vmem:[#allocation2 + $0xb8] sm:$0xff]   ;;  %1001 = vmatpush3.bf16.msra.mxu0 %v1125_v2  ;;  %v1130_v7 = vld [vmem:[#allocation2 + $0xb0] sm:$0xff]   ;;  %v1133_v10 = vld [vmem:[#allocation2 + $0x28] sm:$0xff]   ;;  %v171_v29 = vunpack.c.0.s8 %v170_v23 }
  0x11   :  { %1023 = vmatpush3.bf16.msra.mxu1 %v1126_v3  ;;  %1002 = vmatprep.subr.bf16.mxu0 %v1127_v4  ;;  %v1134_v11 = vld [vmem:[#allocation2 + $0xa8] sm:$0xff]   ;;  %v1135_v12 = vld [vmem:[#allocation2 + $0x60] sm:$0xff]   ;;  %v1139_v16 = vld [vmem:[#allocation2 + $0x58] sm:$0xff]  }
  0x12   :  { %1024 = vmatprep.subr.bf16.mxu1 %v1128_v5  ;;  %v1136_v13 = vld [vmem:[#allocation2 + $0xe0] sm:$0xff]   ;;  %v1140_v17 = vld [vmem:[#allocation2 + $0xd8] sm:$0xff]   ;;  %v1143_v20 = vld [vmem:[#allocation2 + $0x50] sm:$0xff]   ;;  %v1265_v35 = vsub.s32 %v171_v29, %v173_v30 }
  0x13   :  { %v1137_v14 = vld [vmem:[#allocation2 + $0x20] sm:$0xff]   ;;  %v1141_v18 = vld [vmem:[#allocation2 + $0x18] sm:$0xff]   ;;  %v1144_v21 = vld [vmem:[#allocation2 + $0xd0] sm:$0xff]  }
  0x14   :  { %1003 = vmatpush3.bf16.msra.mxu0 %v1129_v6  ;;  %v1138_v15 = vld [vmem:[#allocation2 + $0xa0] sm:$0xff]   ;;  %v1142_v19 = vld [vmem:[#allocation2 + $0x98] sm:$0xff]   ;;  %v1145_v25 = vld [vmem:[#allocation2 + $0x10] sm:$0xff]  }
  0x15   :  { %1025 = vmatpush3.bf16.msra.mxu1 %v1130_v7  ;;  %1004 = vmatprep.subr.bf16.mxu0 %v1131_v8  ;;  %v1146_v26 = vld [vmem:[#allocation2 + $0x90] sm:$0xff]   ;;  %v1147_v27 = vld [vmem:[#allocation2 + $0x48] sm:$0xff]   ;;  %v1151_v33 = vld [vmem:[#allocation2 + $0x40] sm:$0xff]  }
  0x16   :  { %1026 = vmatprep.subr.bf16.mxu1 %v1132_v9  ;;  %v1148_v28 = vld [vmem:[#allocation2 + $0xc8] sm:$0xff]   ;;  %v1152_v34 = vld [vmem:[#allocation2 + $0xc0] sm:$0xff]   ;;  %v1156_v41 = vld [vmem:[#allocation2 + $0x178] sm:$0xff]  }
  0x17   :  { %v1149_v31 = vld [vmem:[#allocation2 + $0x8] sm:$0xff]   ;;  %v1153_v36 = vld [vmem:[#allocation2] sm:$0xff]   ;;  %v1157_v42 = vld [vmem:[#allocation2 + $0x1f8] sm:$0xff]  }
  0x18   :  { %1005 = vmatpush3.bf16.msra.mxu0 %v1133_v10  ;;  %v1150_v32 = vld [vmem:[#allocation2 + $0x88] sm:$0xff]   ;;  %v1154_v37 = vld [vmem:[#allocation2 + $0x80] sm:$0xff]   ;;  %v1158_v46 = vld [vmem:[#allocation2 + $0x138] sm:$0xff]  }
  0x19   :  { %1027 = vmatpush3.bf16.msra.mxu1 %v1134_v11  ;;  %1006 = vmatprep.subr.bf16.mxu0 %v1135_v12  ;;  %v34_v38 = vld [vmem:[%s1319_s0] sm:$0xff]  ;;  %v1159_v48 = vld [vmem:[#allocation2 + $0x1b8] sm:$0xff]   ;;  %v1160_v51 = vld [vmem:[#allocation2 + $0x170] sm:$0xff]  }
  0x1a   :  { %1028 = vmatprep.subr.bf16.mxu1 %v1136_v13  ;;  %v168_v39 = vcombine.high %v34_v38, %v34_v38  ;;  %v175_v40 = vrot.slane %v34_v38, %v1265_v35  ;;  %v1161_v53 = vld [vmem:[#allocation2 + $0x1f0] sm:$0xff]   ;;  %v1164_v58 = vld [vmem:[#allocation2 + $0x168] sm:$0xff]   ;;  %v1168_v62 = vld [vmem:[#allocation2 + $0x160] sm:$0xff]  }
  0x1b   :  { %v1162_v55 = vld [vmem:[#allocation2 + $0x130] sm:$0xff]   ;;  %v1165_v59 = vld [vmem:[#allocation2 + $0x1e8] sm:$0xff]   ;;  %v1169_v63 = vld [vmem:[#allocation2 + $0x1e0] sm:$0xff]  }
  0x1c   :  { %1007 = vmatpush3.bf16.msra.mxu0 %v1137_v14  ;;  %v183_v43 = vcombine.high %v175_v40, %v175_v40  ;;  %v191_v44 = vrot.slane %v175_v40, %v1265_v35  ;;  %v1273_v45 = vrot.slane %v168_v39, %v1265_v35  ;;  %v1163_v56 = vld [vmem:[#allocation2 + $0x1b0] sm:$0xff]   ;;  %v1166_v60 = vld [vmem:[#allocation2 + $0x128] sm:$0xff]   ;;  %v1170_v0 = vld [vmem:[#allocation2 + $0x120] sm:$0xff]  }
  0x1d   :  { %1029 = vmatpush3.bf16.msra.mxu1 %v1138_v15  ;;  %1008 = vmatprep.subr.bf16.mxu0 %v1139_v16  ;;  %v1167_v61 = vld [vmem:[#allocation2 + $0x1a8] sm:$0xff]   ;;  %v1171_v1 = vld [vmem:[#allocation2 + $0x1a0] sm:$0xff]   ;;  %v1172_v2 = vld [vmem:[#allocation2 + $0x158] sm:$0xff]  }
  0x1e   :  { %1030 = vmatprep.subr.bf16.mxu1 %v1140_v17  ;;  %v205_v47 = vrot.slane %v183_v43, %v1265_v35  ;;  %v184_v49 = vcombine.high %v1273_v45, %v1273_v45  ;;  %v213_v50 = vcombine.high %v191_v44, %v191_v44  ;;  %v1173_v3 = vld [vmem:[#allocation2 + $0x1d8] sm:$0xff]   ;;  %v1176_v6 = vld [vmem:[#allocation2 + $0x150] sm:$0xff]   ;;  %v1180_v10 = vld [vmem:[#allocation2 + $0x148] sm:$0xff]  }
  0x1f   :  { %v1174_v4 = vld [vmem:[#allocation2 + $0x118] sm:$0xff]   ;;  %v1177_v7 = vld [vmem:[#allocation2 + $0x1d0] sm:$0xff]   ;;  %v1181_v11 = vld [vmem:[#allocation2 + $0x1c8] sm:$0xff]  }
  0x20   :  { %1009 = vmatpush3.bf16.msra.mxu0 %v1141_v18  ;;  %641 = vmatprep.mubr.bf16.mxu0 %v205_v47  ;;  %v215_v52 = vcombine.high %v205_v47, %v205_v47  ;;  %v212_v54 = vrot.slane %v184_v49, %v1265_v35  ;;  %v1175_v5 = vld [vmem:[#allocation2 + $0x198] sm:$0xff]   ;;  %v1178_v8 = vld [vmem:[#allocation2 + $0x110] sm:$0xff]   ;;  %v1182_v12 = vld [vmem:[#allocation2 + $0x108] sm:$0xff]   ;;  %v198_v18 = vrot.slane %v1273_v45, %v1265_v35 }
  0x21   :  { %1031 = vmatpush3.bf16.msra.mxu1 %v1142_v19  ;;  %1010 = vmatprep.subr.bf16.mxu0 %v1143_v20  ;;  %v1179_v9 = vld [vmem:[#allocation2 + $0x190] sm:$0xff]   ;;  %v1183_v13 = vld [vmem:[#allocation2 + $0x188] sm:$0xff]   ;;  %v1184_v14 = vld [vmem:[#allocation2 + $0x140] sm:$0xff]  }
  0x22   :  { %1032 = vmatprep.subr.bf16.mxu1 %v1144_v21  ;;  %681 = vmatprep.mubr.bf16.mxu1 %v215_v52  ;;  %v216_v57 = vcombine.high %v212_v54, %v212_v54  ;;  %v1185_v15 = vld [vmem:[#allocation2 + $0x1c0] sm:$0xff]   ;;  %v214_v19 = vcombine.high %v198_v18, %v198_v18  ;;  %v1188_v20 = vld [vmem:[%s1321_s2 + $0x38] sm:$0xff]   ;;  %v1232_v21 = vmov 0.0   ;;  %v1189_v22 = vld [vmem:[%s1321_s2 + $0x30] sm:$0xff]  }
  0x23   :  { %v1186_v16 = vld [vmem:[#allocation2 + $0x100] sm:$0xff]   ;;  %v1190_v23 = vld [vmem:[%s1321_s2 + $0x28] sm:$0xff]  }
  0x24   :  { %1011 = vmatpush3.bf16.msra.mxu0 %v1145_v25  ;;  %v1187_v17 = vld [vmem:[#allocation2 + $0x180] sm:$0xff]  }
  0x25   :  { %1033 = vmatpush3.bf16.msra.mxu1 %v1146_v26  ;;  %1012 = vmatprep.subr.bf16.mxu0 %v1147_v27  ;;  %v1191_v25 = vld [vmem:[%s1321_s2 + $0x20] sm:$0xff]   ;;  %v1192_v26 = vld [vmem:[%s1321_s2 + $0x18] sm:$0xff]   ;;  %v1193_v27 = vld [vmem:[%s1321_s2 + $0x10] sm:$0xff]  }
  0x26   :  { %1034 = vmatprep.subr.bf16.mxu1 %v1148_v28  ;;  %v1194_v28 = vld [vmem:[%s1321_s2 + $0x8] sm:$0xff]   ;;  %v1195_v29 = vld [vmem:[%s1321_s2] sm:$0xff]  }
  0x27   :  { %v926_v39 = vld [vmem:[%s1322_s3] ss:$0 sm:$0xff] }
  0x28   :  { %1013 = vmatpush3.bf16.msra.mxu0 %v1149_v31 }
  0x29   :  { %1035 = vmatpush3.bf16.msra.mxu1 %v1150_v32  ;;  %1014 = vmatprep.subr.bf16.mxu0 %v1151_v33 }
  0x2a   :  { %1036 = vmatprep.subr.bf16.mxu1 %v1152_v34 }
  0x2c   :  { %1015 = vmatpush3.bf16.msra.mxu0 %v1153_v36 }
  0x2d   :  { %1037 = vmatpush3.bf16.msra.mxu1 %v1154_v37  ;;  %1044 = vmatprep.subr.bf16.mxu0 %v1156_v41 }
  0x2e   :  { %1066 = vmatprep.subr.bf16.mxu1 %v1157_v42 }
  0x2f   :  { %642 = vmatmul.mubr.bf16.vlgmr.msra.gmra.mxu0 %v191_v44 }
  0x30   :  { %1045 = vmatpush3.bf16.msra.mxu0 %v1158_v46  ;;  %682 = vmatmul.mubr.bf16.vlgmr.msra.gmra.mxu1 %v213_v50 }
  0x31   :  { %1046 = vmatprep.subr.bf16.mxu0 %v1160_v51  ;;  %1067 = vmatpush3.bf16.msra.mxu1 %v1159_v48 }
  0x32   :  { %721 = vmatprep.mubr.bf16.mxu0 %v212_v54  ;;  %1068 = vmatprep.subr.bf16.mxu1 %v1161_v53 }
  0x33   :  { %761 = vmatprep.mubr.bf16.mxu1 %v216_v57  ;;  %v880_v57 = vand.u32 127, %v172_v24 }
  0x34   :  { %1047 = vmatpush3.bf16.msra.mxu0 %v1162_v55 }
  0x35   :  { %1048 = vmatprep.subr.bf16.mxu0 %v1164_v58  ;;  %1069 = vmatpush3.bf16.msra.mxu1 %v1163_v56  ;;  %v991_v58 = vld [vmem:[%s1322_s3 + $0x1] ss:$0 sm:$0xff]  ;;  %vm881_vm1 = vcmp.lt.s32.totalorder %v880_v57, 4  ;;  %vm882_vm3 = vcmp.ge.s32.totalorder %v880_v57, 4  ;;  %vm883_vm4 = vcmp.lt.s32.totalorder %v880_v57, 8  ;;  %vm885_vm5 = vcmp.ge.s32.totalorder %v880_v57, 68 }
  0x36   :  { %1070 = vmatprep.subr.bf16.mxu1 %v1165_v59  ;;  %vm886_vm6 = vcmp.lt.s32.totalorder %v880_v57, 72  ;;  %vm884_vm7 = vmand %vm882_vm3, %vm883_vm4 }
  0x37   :  { %vm887_vm8 = vmand %vm885_vm5, %vm886_vm6 }
  0x38   :  { %1049 = vmatpush3.bf16.msra.mxu0 %v1166_v60  ;;  %vm917_vm9 = vmor %vm881_vm1, %vm884_vm7 }
  0x39   :  { %1050 = vmatprep.subr.bf16.mxu0 %v1168_v62  ;;  %1071 = vmatpush3.bf16.msra.mxu1 %v1167_v61  ;;  %vm918_vm10 = vmor %vm917_vm9, %vm887_vm8 }
  0x3a   :  { %1072 = vmatprep.subr.bf16.mxu1 %v1169_v63 }
  0x3c   :  { %1051 = vmatpush3.bf16.msra.mxu0 %v1170_v0 }
  0x3d   :  { %1052 = vmatprep.subr.bf16.mxu0 %v1172_v2  ;;  %1073 = vmatpush3.bf16.msra.mxu1 %v1171_v1 }
  0x3e   :  { %1074 = vmatprep.subr.bf16.mxu1 %v1173_v3 }
  0x40   :  { %1053 = vmatpush3.bf16.msra.mxu0 %v1174_v4 }
  0x41   :  { %1054 = vmatprep.subr.bf16.mxu0 %v1176_v6  ;;  %1075 = vmatpush3.bf16.msra.mxu1 %v1175_v5 }
  0x42   :  { %1076 = vmatprep.subr.bf16.mxu1 %v1177_v7 }
  0x44   :  { %1055 = vmatpush3.bf16.msra.mxu0 %v1178_v8 }
  0x45   :  { %1056 = vmatprep.subr.bf16.mxu0 %v1180_v10  ;;  %1077 = vmatpush3.bf16.msra.mxu1 %v1179_v9 }
  0x46   :  { %1078 = vmatprep.subr.bf16.mxu1 %v1181_v11 }
  0x48   :  { %1057 = vmatpush3.bf16.msra.mxu0 %v1182_v12 }
  0x49   :  { %1058 = vmatprep.subr.bf16.mxu0 %v1184_v14  ;;  %1079 = vmatpush3.bf16.msra.mxu1 %v1183_v13 }
  0x4a   :  { %1080 = vmatprep.subr.bf16.mxu1 %v1185_v15 }
  0x4c   :  { %1059 = vmatpush3.bf16.msra.mxu0 %v1186_v16 }
  0x4d   :  { %1081 = vmatpush3.bf16.msra.mxu1 %v1187_v17  ;;  %1097 = vmatprep.subr.bf16.mxu0 %v1232_v21 }
  0x4f   :  { %722 = vmatmul.mubr.bf16.vlgmr.msra.gmra.mxu0 %v198_v18 }
  0x50   :  { %762 = vmatmul.mubr.bf16.vlgmr.msra.gmra.mxu1 %v214_v19  ;;  %1098 = vmatpush3.bf16.msra.mxu0 %v1188_v20 }
  0x51   :  { %1099 = vmatprep.subr.bf16.mxu0 %v1232_v21  ;;  %1113 = vmatprep.mubr.msk.bf16.mxu0 %vm1233_vm0, %v1232_v21 }
  0x54   :  { %1100 = vmatpush3.bf16.msra.mxu0 %v1189_v22 }
  0x55   :  { %1101 = vmatprep.subr.bf16.mxu0 %v1232_v21 }
  0x58   :  { %1102 = vmatpush3.bf16.msra.mxu0 %v1190_v23 }
  0x59   :  { %1103 = vmatprep.subr.bf16.mxu0 %v1232_v21 }
  0x5c   :  { %1104 = vmatpush3.bf16.msra.mxu0 %v1191_v25 }
  0x5d   :  { %1105 = vmatprep.subr.bf16.mxu0 %v1232_v21 }
  0x60   :  { %1106 = vmatpush3.bf16.msra.mxu0 %v1192_v26 }
  0x61   :  { %1107 = vmatprep.subr.bf16.mxu0 %v1232_v21 }
  0x64   :  { %1108 = vmatpush3.bf16.msra.mxu0 %v1193_v27 }
  0x65   :  { %1109 = vmatprep.subr.bf16.mxu0 %v1232_v21 }
  0x68   :  { %1110 = vmatpush3.bf16.msra.mxu0 %v1194_v28 }
  0x69   :  { %1111 = vmatprep.subr.bf16.mxu0 %v1232_v21 }
  0x6c   :  { %1112 = vmatpush3.bf16.msra.mxu0 %v1195_v29 }
  0xef   :  { %v1016_v30 = vpop.f32.mrf.mxu0 }
  0xf0   :  { %v1038_v31 = vpop.f32.mrf.mxu1 }
  0xf1   :  { %v1017_v32 = vpop.f32.mrf.mxu0 }
  0xf2   :  { %v1039_v33 = vpop.f32.mrf.mxu1  ;;  %v1018_v38 = vadd.f32 %v1017_v32, %v1016_v30 }
  0xf3   :  { %v1019_v34 = vpop.f32.mrf.mxu0  ;;  %v1040_v41 = vadd.f32 %v1039_v33, %v1038_v31 }
  0xf4   :  { %v1041_v35 = vpop.f32.mrf.mxu1  ;;  %v644_v40 = vadd.f32 %v1018_v38, %v926_v39 }
  0xf5   :  { %v1020_v36 = vpop.f32.mrf.mxu0 }
  0xf6   :  { %v1042_v37 = vpop.f32.mrf.mxu1  ;;  %v684_v45 = vadd.f32 %v1040_v41, %v644_v40 }
 0x10f   :  { %v1060_v42 = vpop.f32.mrf.mxu0 }
 0x110   :  { %v1082_v43 = vpop.f32.mrf.mxu1 }
 0x111   :  { %v1061_v44 = vpop.f32.mrf.mxu0 }
 0x112   :  { %v1062_v46 = vadd.f32 %v1061_v44, %v1060_v42  ;;  %v1083_v47 = vpop.f32.mrf.mxu1 }
 0x113   :  { %v1063_v48 = vpop.f32.mrf.mxu0  ;;  %v1084_v50 = vadd.f32 %v1083_v47, %v1082_v43 }
 0x114   :  { %v724_v49 = vadd.f32 %v1062_v46, %v684_v45  ;;  %v1085_v51 = vpop.f32.mrf.mxu1 }
 0x115   :  { %v1064_v52 = vpop.f32.mrf.mxu0 }
 0x116   :  { %v764_v53 = vadd.f32 %v1084_v50, %v724_v49  ;;  %v1086_v54 = vpop.f32.mrf.mxu1 }
 0x118   :  { %v769_v55 = vmax.f32 %v764_v53, 0.0 }
 0x11a   :  { %v770_v56 = vpack.c.bf16 %v769_v55, %v769_v55 }
 0x11c   :  { %1114 = vmatmul.mubr.bf16.vlgmr.msra.gmra.mxu0 %v770_v56 }
 0x1dc   :  { %v873_v59 = vpop.f32.mrf.mxu0 }
 0x1dd   :  { %v874_v60 = vadd.f32 %v991_v58, %v873_v59 }
 0x1de   :  { %v1115_v61 = vpop.f32.mrf.mxu0 }
 0x1df   :  { %v888_v62 = vsel %vm881_vm1, %v874_v60, -1e+30 }
 0x1e0   :  { %v876_v63 = vpop.f32.mrf.mxu0  ;;  %v890_v0 = vsel %vm889_vm2, %v888_v62, -inf }
 0x1e1   :  { %891 = vmax.xlane.f32.xlu0 %v890_v0 }
 0x1e2   :  { %v1116_v1 = vpop.f32.mrf.mxu0 }
 0x1f7   :  { %902 = vrot.lane.b32.xlu0 %v874_v60, %s1229_s18 }
 0x26a   :  { %v892_v2 = vpop.xlane.xlu0 %891 }
 0x26b   :  { %v893_v3 = vsub.f32 %v888_v62, %v892_v2 }
 0x26d   :  { %v894_v24 = vmul.f32 1.442695, %v893_v3 }
 0x26e   :  { %v903_v6 = vpop.permute.xlu0 %902 }
 0x26f   :  { %1196 = vpow2.f32 %v894_v24  ;;  %v904_v7 = vmax.f32 %v874_v60, %v903_v6 }
 0x271   :  { %v905_v8 = vsub.f32 %v874_v60, %v904_v7  ;;  %v908_v9 = vsub.f32 %v903_v6, %v904_v7 }
 0x273   :  { %v906_v10 = vmul.f32 1.442695, %v905_v8  ;;  %v909_v11 = vmul.f32 1.442695, %v908_v9 }
 0x275   :  { %1198 = vpow2.f32 %v906_v10 }
 0x276   :  { %1200 = vpow2.f32 %v909_v11 }
 0x27c   :  { %v1197_v4 = vpop.eup %1196 }
 0x27d   :  { %v896_v5 = vsel %vm889_vm2, %v1197_v4, 0.0 }
 0x27e   :  { %897 = vadd.xlane.f32.xlu1 %v896_v5 }
 0x282   :  { %v1199_v12 = vpop.eup %1198 }
 0x283   :  { %v1201_v13 = vpop.eup %1200 }
 0x284   :  { %v911_v14 = vadd.f32 %v1201_v13, %v1199_v12 }
 0x286   :  { %1202 = vlog2.f32 %v911_v14 }
 0x293   :  { %v1203_v16 = vpop.eup %1202 }
 0x294   :  { %v913_v17 = vmul.f32 0.6931472, %v1203_v16 }
 0x296   :  { %v914_v20 = vadd.f32 %v913_v17, %v904_v7 }
 0x307   :  { %v898_v15 = vpop.xlane.xlu1 %897 }
 0x308   :  { %1204 = vlog2.f32 %v898_v15 }
 0x315   :  { %v1205_v18 = vpop.eup %1204 }
 0x316   :  { %v900_v19 = vmul.f32 0.6931472, %v1205_v18 }
 0x318   :  { %v901_v21 = vadd.f32 %v900_v19, %v892_v2 }
 0x31a   :  { %v915_v22 = vsel %vm881_vm1, %v901_v21, %v914_v20 }
 0x31b   :  { %v916_v23 = vsub.f32 %v874_v60, %v915_v22 }
 0x31d   :  { %v919_v25 = vsel %vm918_vm10, %v916_v23, 0.0 }
 0x31e   :  { %920 = vst [vmem:[%s1323_s4] sm:$0x3] %v919_v25 }
 0x31f   :  { %925 = vsyncpa [#allocation3], 1 }

</bundles_post_ra>
